<compile_context>
chip_gen: v5e
topology: v5e:2x2
jax: 0.10.0
libtpu: 0.0.40
codegen_flags: <defaults>
</compile_context>

<pallas_src>
import jax
import jax.numpy as jnp
from jax.experimental import pallas as pl
from jax.experimental.pallas import tpu as pltpu

_F_IN = 12    # Linear(12, 5)
_F_HID = 5
_F_OUT = 1
_PACK = 32    # rows packed per super-row: 32*12 = 384 = 3*128 lanes
_SUB = 1024   # packed rows per in-kernel compute chunk (bounds VMEM temporaries)


def _mlp_kernel(x_ref, w1_ref, b1_ref, w2_ref, b2_ref, o_ref):
    # x_ref : (tbp, 384)  packed activations (32 rows of 12 features each)
    # w1_ref: (384, 160)  bf16 block-diagonal kron(I32, W1)
    # b1_ref: (1, 160)    f32
    # w2_ref: (160, 32)   bf16 block-diagonal kron(I32, W2)
    # b2_ref: (1, 32)     f32
    # o_ref : (tbp, 32)   f32 packed outputs (32 scalar outputs per super row)
    tbp = x_ref.shape[0]
    sub = _SUB if (tbp % _SUB == 0) else tbp  # static chunking of the batch tile

    def body(c, carry):
        r0 = pl.multiple_of(c * sub, sub)
        x = x_ref[pl.ds(r0, sub), :].astype(jnp.bfloat16)
        h = jnp.dot(x, w1_ref[...], preferred_element_type=jnp.float32)
        h = jnp.maximum(h + b1_ref[...], 0.0)                      # bias + ReLU
        y = jnp.dot(h.astype(jnp.bfloat16), w2_ref[...],
                    preferred_element_type=jnp.float32) + b2_ref[...]
        o_ref[pl.ds(r0, sub), :] = y.astype(o_ref.dtype)
        return carry

    jax.lax.fori_loop(0, tbp // sub, body, 0)


def _pack_params(w1, b1, w2, b2, p):
    """Expand the tiny weights into block-diagonal form for row packing."""
    eye = jnp.eye(p, dtype=jnp.float32)
    w1b = jnp.kron(eye, w1.astype(jnp.float32)).astype(jnp.bfloat16)  # (12p, 5p)
    w2b = jnp.kron(eye, w2.astype(jnp.float32)).astype(jnp.bfloat16)  # (5p,  p)
    b1b = jnp.tile(b1.astype(jnp.float32), p).reshape(1, -1)          # (1, 5p)
    b2b = jnp.tile(b2.astype(jnp.float32), p).reshape(1, -1)          # (1, p)
    return w1b, b1b, w2b, b2b


def _jax_forward(x, w1, b1, w2, b2):
    """Plain-JAX forward with the kernel's exact numerics (bf16 operands,
    f32 accumulation).  Used for tiny batches / ragged tails and as reference."""
    h = jnp.dot(x.astype(jnp.bfloat16), w1.astype(jnp.bfloat16),
                preferred_element_type=jnp.float32) + b1.astype(jnp.float32)
    h = jnp.maximum(h, 0.0)
    y = jnp.dot(h.astype(jnp.bfloat16), w2.astype(jnp.bfloat16),
                preferred_element_type=jnp.float32) + b2.astype(jnp.float32)
    return y


def _round_up(x, m):
    return ((x + m - 1) // m) * m


def net_forward(x, w1, b1, w2, b2, *, block_rows=131072):
    """Forward pass of Net.

    x : (B, 12) float32 (or bfloat16 for half the HBM traffic)
    w1: (12, 5), b1: (5,), w2: (5, 1), b2: (1,)   (stored as (in, out))
    returns: (B, 1) float32
    """
    B, F = x.shape
    assert F == _F_IN, f"expected {_F_IN} input features, got {F}"
    P = _PACK

    B_main = (B // P) * P
    if B_main == 0:
        # Batch too small to pack: a kernel launch would be pure overhead.
        return _jax_forward(x, w1, b1, w2, b2)

    n_p = B_main // P
    # Row packing: free row-major reshape when B % 32 == 0; otherwise only the
    # leading B_main rows are sliced (no full-tensor pad), and the <=31-row tail
    # is computed by the plain-JAX epilogue below.
    xp = (x if B_main == B else x[:B_main]).reshape(n_p, P * F)

    w1b, b1b, w2b, b2b = _pack_params(w1, b1, w2, b2, P)

    # --- batch-tile selection ------------------------------------------------
    # Default: 4096 packed rows per grid step (~6.8 MiB HBM moved per step).
    tbp_max = max(8, (block_rows // P // 8) * 8)
    if n_p > tbp_max:
        tbp = tbp_max
    elif n_p >= 16:
        # Ensure >=2 grid steps so a second TensorCore (v7x megacore) gets work;
        # on single-core parts the extra step costs one ~0.35us overhead only.
        tbp = _round_up((n_p + 1) // 2, 8)
    else:
        tbp = n_p  # single full-extent block
    grid = (pl.cdiv(n_p, tbp),)

    row_bytes = P * F * xp.dtype.itemsize + P * 4  # activations in + outputs out
    cost = pl.CostEstimate(
        flops=2 * n_p * (P * F * P * _F_HID + P * _F_HID * P * _F_OUT),
        transcendentals=0,
        bytes_accessed=n_p * row_bytes
        + w1b.size * 2 + w2b.size * 2 + b1b.size * 4 + b2b.size * 4,
    )

    out_p = pl.pallas_call(
        _mlp_kernel,
        out_shape=jax.ShapeDtypeStruct((n_p, P), jnp.float32),
        grid_spec=pltpu.PrefetchScalarGridSpec(
            num_scalar_prefetch=0,
            grid=grid,
            in_specs=[
                # Streaming activations: tiled along the (packed) batch axis.
                pl.BlockSpec((tbp, P * F), lambda i: (i, 0)),
                # Weights / biases: constant index_map => resident in VMEM.
                pl.BlockSpec(w1b.shape, lambda i: (0, 0)),
                pl.BlockSpec(b1b.shape, lambda i: (0, 0)),
                pl.BlockSpec(w2b.shape, lambda i: (0, 0)),
                pl.BlockSpec(b2b.shape, lambda i: (0, 0)),
            ],
            out_specs=pl.BlockSpec((tbp, P), lambda i: (i, 0)),
        ),
        compiler_params=pltpu.CompilerParams(
            dimension_semantics=("parallel",),     # batch tiles are independent
            vmem_limit_bytes=48 * 1024 * 1024,     # fits v7x's 64 MiB with headroom
        ),
        cost_estimate=cost,
    )(xp, w1b, b1b, w2b, b2b)

    # (n_p, 32) row-major == (B_main,) in original row order.
    out_main = out_p.reshape(B_main, 1)
    if B_main == B:
        return out_main
    tail = _jax_forward(x[B_main:], w1, b1, w2, b2)
    return jnp.concatenate([out_main, tail], axis=0)


def init_params(key):
    """Deterministic init matching the PyTorch module's parameter shapes.

    PyTorch nn.Linear(12, 5): weight (5, 12), bias (5,)
    PyTorch nn.Linear(5, 1):  weight (1, 5),  bias (1,)
    Weights are stored transposed as (in, out) for the kernel.
    """
    k1, k2, k3, k4 = jax.random.split(key, 4)
    lim1 = 1.0 / jnp.sqrt(12.0)
    lim2 = 1.0 / jnp.sqrt(5.0)
    w1 = jax.random.uniform(k1, (_F_IN, _F_HID), jnp.float32, -lim1, lim1)
    b1 = jax.random.uniform(k2, (_F_HID,), jnp.float32, -lim1, lim1)
    w2 = jax.random.uniform(k3, (_F_HID, _F_OUT), jnp.float32, -lim2, lim2)
    b2 = jax.random.uniform(k4, (_F_OUT,), jnp.float32, -lim2, lim2)
    return w1, b1, w2, b2


if __name__ == "__main__":
    key = jax.random.PRNGKey(0)
    kx1, kx2, kp = jax.random.split(key, 3)
    w1, b1, w2, b2 = init_params(kp)

    fwd = jax.jit(net_forward)
    # Tolerance note: the kernel (and reference) use bf16 operands with f32
    # accumulation; only accumulation-order / double-rounding noise remains.
    TOL = dict(atol=2e-2, rtol=2e-2)

    # 1) Batch that is a multiple of 32: pure-kernel path, 2-step grid.
    B = 4096
    x = jax.random.normal(kx1, (B, _F_IN), jnp.float32)
    out = jax.block_until_ready(fwd(x, w1, b1, w2, b2))
    ref = _jax_forward(x, w1, b1, w2, b2)
    assert out.shape == (B, 1) and out.dtype == jnp.float32
    assert jnp.allclose(out, ref, **TOL)

    # 2) Ragged batch: slice + plain-JAX tail epilogue + clipped last block.
    B2 = 1000
    x2 = jax.random.normal(kx2, (B2, _F_IN), jnp.float32)
    out2 = jax.block_until_ready(fwd(x2, w1, b1, w2, b2))
    ref2 = _jax_forward(x2, w1, b1, w2, b2)
    assert out2.shape == (B2, 1)
    assert jnp.allclose(out2, ref2, **TOL)

    # 3) Small explicit tile: exercises a multi-step (4) pipelined grid.
    out3 = jax.block_until_ready(net_forward(x, w1, b1, w2, b2, block_rows=1024))
    assert jnp.allclose(out3, ref, **TOL)

    print("KERNEL_OK")
</pallas_src>

<mosaic_0001>
module attributes {stable_mosaic.version = 11 : i64} {
  func.func @_mlp_kernel(%arg0: i32, %arg1: memref<64x384xf32, #tpu.memory_space<vmem>>, %arg2: memref<384x160xbf16, #tpu.memory_space<vmem>>, %arg3: memref<1x160xf32, #tpu.memory_space<vmem>>, %arg4: memref<160x32xbf16, #tpu.memory_space<vmem>>, %arg5: memref<1x32xf32, #tpu.memory_space<vmem>>, %arg6: memref<64x32xf32, #tpu.memory_space<vmem>>) attributes {dimension_semantics = [#tpu.dimension_semantics<parallel>], iteration_bounds = array<i64: 2>, scalar_prefetch = 0 : i64, scratch_operands = 0 : i64, tpu.core_type = #tpu.core_type<tc>, window_params = [{transform_indices = @transform_0, window_bounds = array<i64: 64, 384>}, {pipeline_mode = #tpu.pipeline_mode<synchronous>, transform_indices = @transform_1, window_bounds = array<i64: 384, 160>}, {pipeline_mode = #tpu.pipeline_mode<synchronous>, transform_indices = @transform_2, window_bounds = array<i64: 1, 160>}, {pipeline_mode = #tpu.pipeline_mode<synchronous>, transform_indices = @transform_3, window_bounds = array<i64: 160, 32>}, {pipeline_mode = #tpu.pipeline_mode<synchronous>, transform_indices = @transform_4, window_bounds = array<i64: 1, 32>}, {transform_indices = @transform_5, window_bounds = array<i64: 64, 32>}]} {
    %c0_i32 = arith.constant 0 : i32
    %c64_i32 = arith.constant 64 : i32
    %0 = arith.muli %c0_i32, %c64_i32 : i32
    %1 = tpu.assume_multiple %0, 64 : i32
    %2 = arith.index_cast %1 : i32 to index
    %c0 = arith.constant 0 : index
    %3 = vector.load %arg1[%2, %c0] : memref<64x384xf32, #tpu.memory_space<vmem>>, vector<64x384xf32>
    %4 = arith.truncf %3 : vector<64x384xf32> to vector<64x384xbf16>
    %c0_0 = arith.constant 0 : index
    %c0_1 = arith.constant 0 : index
    %5 = vector.load %arg2[%c0_0, %c0_1] : memref<384x160xbf16, #tpu.memory_space<vmem>>, vector<384x160xbf16>
    %cst = arith.constant dense<0.000000e+00> : vector<64x160xf32>
    %6 = tpu.matmul %4, %5, %cst {dimension_numbers = #tpu.dot_dimension_numbers<[1], [0], [0], [1], [0, 0, 1, 1], [], []>} : vector<64x384xbf16>, vector<384x160xbf16>, vector<64x160xf32> -> vector<64x160xf32>
    %c0_2 = arith.constant 0 : index
    %c0_3 = arith.constant 0 : index
    %7 = vector.load %arg3[%c0_2, %c0_3] : memref<1x160xf32, #tpu.memory_space<vmem>>, vector<1x160xf32>
    %8 = vector.broadcast %7 : vector<1x160xf32> to vector<64x160xf32>
    %9 = arith.addf %6, %8 : vector<64x160xf32>
    %cst_4 = arith.constant 0.000000e+00 : f32
    %10 = vector.broadcast %cst_4 : f32 to vector<64x160xf32>
    %11 = arith.maximumf %9, %10 : vector<64x160xf32>
    %12 = arith.truncf %11 : vector<64x160xf32> to vector<64x160xbf16>
    %c0_5 = arith.constant 0 : index
    %c0_6 = arith.constant 0 : index
    %13 = vector.load %arg4[%c0_5, %c0_6] : memref<160x32xbf16, #tpu.memory_space<vmem>>, vector<160x32xbf16>
    %cst_7 = arith.constant dense<0.000000e+00> : vector<64x32xf32>
    %14 = tpu.matmul %12, %13, %cst_7 {dimension_numbers = #tpu.dot_dimension_numbers<[1], [0], [0], [1], [0, 0, 1, 1], [], []>} : vector<64x160xbf16>, vector<160x32xbf16>, vector<64x32xf32> -> vector<64x32xf32>
    %c0_8 = arith.constant 0 : index
    %c0_9 = arith.constant 0 : index
    %15 = vector.load %arg5[%c0_8, %c0_9] : memref<1x32xf32, #tpu.memory_space<vmem>>, vector<1x32xf32>
    %16 = vector.broadcast %15 : vector<1x32xf32> to vector<64x32xf32>
    %17 = arith.addf %14, %16 : vector<64x32xf32>
    %18 = arith.index_cast %1 : i32 to index
    %c0_10 = arith.constant 0 : index
    %19 = vector.load %arg6[%18, %c0_10] : memref<64x32xf32, #tpu.memory_space<vmem>>, vector<64x32xf32>
    tpu.vector_store %arg6[%18, %c0_10], %17 {strides = array<i32>} : memref<64x32xf32, #tpu.memory_space<vmem>>, vector<64x32xf32>,
    %c1_i32 = arith.constant 1 : i32
    return
  }
  func.func @transform_0(%arg0: i32) -> (i32, i32) {
    %c0_i32 = arith.constant 0 : i32
    %c0_i32_0 = arith.constant 0 : i32
    return %arg0, %c0_i32 : i32, i32
  }
  func.func @transform_1(%arg0: i32) -> (i32, i32) {
    %c0_i32 = arith.constant 0 : i32
    %c0_i32_0 = arith.constant 0 : i32
    %c0_i32_1 = arith.constant 0 : i32
    return %c0_i32, %c0_i32_0 : i32, i32
  }
  func.func @transform_2(%arg0: i32) -> (i32, i32) {
    %c0_i32 = arith.constant 0 : i32
    %c0_i32_0 = arith.constant 0 : i32
    %c0_i32_1 = arith.constant 0 : i32
    return %c0_i32, %c0_i32_0 : i32, i32
  }
  func.func @transform_3(%arg0: i32) -> (i32, i32) {
    %c0_i32 = arith.constant 0 : i32
    %c0_i32_0 = arith.constant 0 : i32
    %c0_i32_1 = arith.constant 0 : i32
    return %c0_i32, %c0_i32_0 : i32, i32
  }
  func.func @transform_4(%arg0: i32) -> (i32, i32) {
    %c0_i32 = arith.constant 0 : i32
    %c0_i32_0 = arith.constant 0 : i32
    %c0_i32_1 = arith.constant 0 : i32
    return %c0_i32, %c0_i32_0 : i32, i32
  }
  func.func @transform_5(%arg0: i32) -> (i32, i32) {
    %c0_i32 = arith.constant 0 : i32
    %c0_i32_0 = arith.constant 0 : i32
    return %arg0, %c0_i32 : i32, i32
  }
}

</mosaic_0001>

<bundles_post_ra>
// kernel: tile.13
= control target key start
LH: loop header
LB: loop body
LE: loop exit
PB: predicated region body
PF: predicated region fallthrough
CT: control target
= control target key end

     0   :  { %s40_s0 = inlined_call_operand.vmem [shape: f32[5], index: 0, kind: input, shape index: {}]   ;;  %s41_s1 = inlined_call_operand.vmem [shape: f32[32,5], index: 1, kind: output, shape index: {}]  }
   0x1   :  { %v4_v0 = vld [vmem:[%s40_s0] ss:$0 sm:$0xff] }
   0x2   :  { %5 = vst [vmem:[%s41_s1] sm:$0xff] %v4_v0 }
   0x3   :  { %12 = vst [vmem:[%s41_s1 + $0x8] sm:$0xff] %v4_v0 }
   0x4   :  { %13 = vst [vmem:[%s41_s1 + $0x10] sm:$0xff] %v4_v0 }
   0x5   :  { %14 = vst [vmem:[%s41_s1 + $0x18] sm:$0xff] %v4_v0 }

// kernel: tile.14
= control target key start
LH: loop header
LB: loop body
LE: loop exit
PB: predicated region body
PF: predicated region fallthrough
CT: control target
= control target key end

     0   :  { %vm9_vm0 = vcmask 23552   ;;  %s280_s12 = smov 125   ;;  %s281_s13 = smov 115   ;;  %vm3_vm1 = vcmask 39936   ;;  %vm13_vm2 = vcmask 15360   ;;  %vm16_vm3 = vcmask 1048552   ;;  %s426_s0 = inlined_call_operand.vmem [shape: f32[32,5], index: 0, kind: input, shape index: {}]   ;;  %s427_s1 = inlined_call_operand.vmem [shape: f32[1,160], index: 1, kind: output, shape index: {}]  }
   0x1   :  { %v216_v0 = vld [vmem:[%s426_s0 + $0x19] sm:$0x1]   ;;  %v219_v3 = vld [vmem:[%s426_s0 + $0x17] sm:$0x1]   ;;  %v221_v4 = vld [vmem:[%s426_s0 + $0x15] sm:$0x1]  }
   0x2   :  { %v217_v1 = vld [vmem:[%s426_s0 + $0x19] sm:$0x1]   ;;  %26 = vrot.lane.b32.xlu1 %v219_v3, %s281_s13  ;;  %s282_s16 = smov 105   ;;  %v218_v5 = vld [vmem:[%s426_s0 + $0x18] sm:$0x1]   ;;  %s283_s21 = smov 120  }
   0x3   :  { %v10_v2 = vsel %vm9_vm0, %v217_v1, %v216_v0  ;;  %38 = vrot.lane.b32.xlu2 %v221_v4, %s282_s16  ;;  %v220_v6 = vld [vmem:[%s426_s0 + $0x16] sm:$0x1]   ;;  %s284_s22 = smov 110   ;;  %v222_v7 = vld [vmem:[%s426_s0 + $0x14] sm:$0x1]   ;;  %s285_s25 = smov 100  }
   0x4   :  { %11 = vrot.lane.b32.xlu0 %v10_v2, %s280_s12  ;;  %v223_v8 = vld [vmem:[%s426_s0 + $0x13] sm:$0x1]   ;;  %v224_v9 = vld [vmem:[%s426_s0 + $0x12] sm:$0x1]   ;;  %s286_s30 = smov 95   ;;  %s287_s2 = smov 90  }
   0x5   :  { %v225_v10 = vld [vmem:[%s426_s0 + $0x11] sm:$0x1]   ;;  %s288_s5 = smov 85   ;;  %v226_v11 = vld [vmem:[%s426_s0 + $0x10] sm:$0x1]   ;;  %s289_s10 = smov 80  }
   0x6   :  { %v227_v12 = vld [vmem:[%s426_s0 + $0xf] sm:$0x1]   ;;  %s290_s11 = smov 75   ;;  %v228_v13 = vld [vmem:[%s426_s0 + $0xe] sm:$0x1]   ;;  %s291_s14 = smov 70  }
   0x7   :  { %v229_v14 = vld [vmem:[%s426_s0 + $0xd] sm:$0x1]   ;;  %v230_v15 = vld [vmem:[%s426_s0 + $0xc] sm:$0x1]   ;;  %s292_s19 = smov 65   ;;  %s293_s20 = smov 60  }
   0x8   :  { %v231_v16 = vld [vmem:[%s426_s0 + $0xb] sm:$0x1]   ;;  %s294_s23 = smov 55   ;;  %v232_v17 = vld [vmem:[%s426_s0 + $0xa] sm:$0x1]   ;;  %s295_s28 = smov 50  }
   0x9   :  { %v233_v18 = vld [vmem:[%s426_s0 + $0x9] sm:$0x1]   ;;  %s296_s29 = smov 45   ;;  %v234_v19 = vld [vmem:[%s426_s0 + $0x8] sm:$0x1]   ;;  %s297_s3 = smov 40  }
   0xa   :  { %32 = vrot.lane.b32.xlu1 %v220_v6, %s284_s22  ;;  %v235_v20 = vld [vmem:[%s426_s0 + $0x7] sm:$0x1]   ;;  %v236_v21 = vld [vmem:[%s426_s0 + $0x6] sm:$0x1]   ;;  %s298_s8 = smov 35   ;;  %s299_s9 = smov 30  }
   0xb   :  { %44 = vrot.lane.b32.xlu2 %v222_v7, %s285_s25  ;;  %v237_v22 = vld [vmem:[%s426_s0 + $0x1f] sm:$0x1]   ;;  %s300_s12 = smov 27   ;;  %v238_v23 = vld [vmem:[%s426_s0 + $0x5] sm:$0x1]   ;;  %s301_s17 = smov 25  }
   0xc   :  { %20 = vrot.lane.b32.xlu0 %v218_v5, %s283_s21  ;;  %v239_v24 = vld [vmem:[%s426_s0 + $0x1e] sm:$0x1]   ;;  %s302_s18 = smov 22   ;;  %v240_v25 = vld [vmem:[%s426_s0 + $0x4] sm:$0x1]   ;;  %s303_s21 = smov 20  }
   0xd   :  { %v241_v26 = vld [vmem:[%s426_s0 + $0x1d] sm:$0x1]   ;;  %v242_v27 = vld [vmem:[%s426_s0 + $0x3] sm:$0x1]   ;;  %s304_s26 = smov 17   ;;  %s305_s27 = smov 15  }
   0xe   :  { %v243_v28 = vld [vmem:[%s426_s0 + $0x1c] sm:$0x1]   ;;  %v244_v29 = vld [vmem:[%s426_s0 + $0x2] sm:$0x1]   ;;  %v245_v30 = vld [vmem:[%s426_s0 + $0x1b] sm:$0x1]  }
   0xf   :  { %s307_s6 = smov 10   ;;  %s308_s7 = smov 7   ;;  %v246_v31 = vld [vmem:[%s426_s0 + $0x1] sm:$0x1]   ;;  %v247_v32 = vld [vmem:[%s426_s0 + $0x1a] sm:$0x1]  }
  0x10   :  { %s310_s13 = smov 2   ;;  %v2_v33 = vld [vmem:[%s426_s0] sm:$0x1]   ;;  %vm22_vm4 = vcmask 1023936   ;;  %vm28_vm5 = vcmask 982936   ;;  %vm34_vm6 = vcmask 941936  }
  0x11   :  { %4 = vst.msk [vmem:[#allocation0] sm:$0x1] %vm3_vm1, %v2_v33   ;;  %vm40_vm7 = vcmask 900936   ;;  %vm46_vm8 = vcmask 859936   ;;  %vm52_vm9 = vcmask 818936   ;;  %vm58_vm10 = vcmask 777936  }
  0x12   :  { %56 = vrot.lane.b32.xlu1 %v224_v9, %s287_s2  ;;  %vm64_vm11 = vcmask 736936   ;;  %vm70_vm12 = vcmask 695936   ;;  %vm76_vm13 = vcmask 654936   ;;  %vm82_vm14 = vcmask 613936  }
  0x13   :  { %62 = vrot.lane.b32.xlu2 %v225_v10, %s288_s5  ;;  %vm136_vm15 = vcmask 261336   ;;  %vm88_vm0 = vcmask 572936   ;;  %vm94_vm1 = vcmask 531936  }
  0x14   :  { %50 = vrot.lane.b32.xlu0 %v223_v8, %s286_s30  ;;  %s306_s30 = smov 12  }
  0x1a   :  { %74 = vrot.lane.b32.xlu1 %v227_v12, %s290_s11 }
  0x1b   :  { %80 = vrot.lane.b32.xlu2 %v228_v13, %s291_s14 }
  0x1c   :  { %68 = vrot.lane.b32.xlu0 %v226_v11, %s289_s10  ;;  %s309_s10 = smov 5  }
  0x22   :  { %92 = vrot.lane.b32.xlu1 %v230_v15, %s293_s20 }
  0x23   :  { %98 = vrot.lane.b32.xlu2 %v231_v16, %s294_s23 }
  0x24   :  { %86 = vrot.lane.b32.xlu0 %v229_v14, %s292_s19 }
  0x2a   :  { %110 = vrot.lane.b32.xlu1 %v233_v18, %s296_s29 }
  0x2b   :  { %116 = vrot.lane.b32.xlu2 %v234_v19, %s297_s3 }
  0x2c   :  { %104 = vrot.lane.b32.xlu0 %v232_v17, %s295_s28 }
  0x32   :  { %128 = vrot.lane.b32.xlu1 %v236_v21, %s299_s9 }
  0x33   :  { %134 = vrot.lane.b32.xlu2 %v237_v22, %s300_s12 }
  0x34   :  { %122 = vrot.lane.b32.xlu0 %v235_v20, %s298_s8 }
  0x3a   :  { %147 = vrot.lane.b32.xlu1 %v239_v24, %s302_s18 }
  0x3b   :  { %154 = vrot.lane.b32.xlu2 %v240_v25, %s303_s21 }
  0x3c   :  { %141 = vrot.lane.b32.xlu0 %v238_v23, %s301_s17 }
  0x42   :  { %167 = vrot.lane.b32.xlu1 %v242_v27, %s305_s27 }
  0x43   :  { %173 = vrot.lane.b32.xlu2 %v243_v28, %s306_s30 }
  0x44   :  { %160 = vrot.lane.b32.xlu0 %v241_v26, %s304_s26 }
  0x4a   :  { %186 = vrot.lane.b32.xlu1 %v245_v30, %s308_s7 }
  0x4b   :  { %193 = vrot.lane.b32.xlu2 %v246_v31, %s309_s10 }
  0x4c   :  { %180 = vrot.lane.b32.xlu0 %v244_v29, %s307_s6 }
  0x54   :  { %199 = vrot.lane.b32.xlu0 %v247_v32, %s310_s13 }
  0x5d   :  { %v39_v34 = vpop.permute.xlu2 %38  }
  0x65   :  { %v45_v35 = vpop.permute.xlu2 %44  }
  0x6d   :  { %v63_v36 = vpop.permute.xlu2 %62  }
  0x74   :  { %v27_v38 = vpop.permute.xlu1 %26  }
  0x75   :  { %v81_v39 = vpop.permute.xlu2 %80  }
  0x76   :  { %v12_v37 = vpop.permute.xlu0 %11  }
  0x77   :  { %15 = vst.msk [vmem:[#allocation0 + $0x8] sm:$0x1] %vm13_vm2, %v12_v37   ;;  %vm100_vm2 = vcmask 490936  }
  0x78   :  { %17 = vst.msk [vmem:[#allocation0] sm:$0x1] %vm16_vm3, %v12_v37   ;;  %vm106_vm3 = vcmask 449936  }
  0x7c   :  { %v33_v41 = vpop.permute.xlu1 %32  }
  0x7d   :  { %v99_v42 = vpop.permute.xlu2 %98  }
  0x7e   :  { %v21_v40 = vpop.permute.xlu0 %20  }
  0x7f   :  { %23 = vst.msk [vmem:[#allocation0] sm:$0x1] %vm22_vm4, %v21_v40   ;;  %vm112_vm4 = vcmask 408936  }
  0x80   :  { %29 = vst.msk [vmem:[#allocation0] sm:$0x1] %vm28_vm5, %v27_v38   ;;  %vm118_vm5 = vcmask 367936  }
  0x81   :  { %35 = vst.msk [vmem:[#allocation0] sm:$0x1] %vm34_vm6, %v33_v41   ;;  %vm124_vm6 = vcmask 326936  }
  0x82   :  { %41 = vst.msk [vmem:[#allocation0] sm:$0x1] %vm40_vm7, %v39_v34   ;;  %vm130_vm7 = vcmask 285936  }
  0x83   :  { %47 = vst.msk [vmem:[#allocation0] sm:$0x1] %vm46_vm8, %v45_v35   ;;  %vm143_vm8 = vcmask 244936  }
  0x84   :  { %v57_v44 = vpop.permute.xlu1 %56  }
  0x85   :  { %v117_v45 = vpop.permute.xlu2 %116  }
  0x86   :  { %v51_v43 = vpop.permute.xlu0 %50  }
  0x87   :  { %53 = vst.msk [vmem:[#allocation0] sm:$0x1] %vm52_vm9, %v51_v43   ;;  %vm149_vm9 = vcmask 220336  }
  0x88   :  { %59 = vst.msk [vmem:[#allocation0] sm:$0x1] %vm58_vm10, %v57_v44   ;;  %vm156_vm10 = vcmask 203936  }
  0x89   :  { %65 = vst.msk [vmem:[#allocation0] sm:$0x1] %vm64_vm11, %v63_v36   ;;  %vm162_vm11 = vcmask 179336  }
  0x8c   :  { %v75_v47 = vpop.permute.xlu1 %74  }
  0x8d   :  { %v135_v48 = vpop.permute.xlu2 %134  }
  0x8e   :  { %v69_v46 = vpop.permute.xlu0 %68   ;;  %138 = vst.msk [vmem:[#allocation0 + $0x8] sm:$0x1] %vm136_vm15, %v135_v48   ;;  %vm188_vm15 = vcmask 97336  }
  0x8f   :  { %71 = vst.msk [vmem:[#allocation0] sm:$0x1] %vm70_vm12, %v69_v46   ;;  %vm169_vm12 = vcmask 162936  }
  0x90   :  { %77 = vst.msk [vmem:[#allocation0] sm:$0x1] %vm76_vm13, %v75_v47   ;;  %vm175_vm13 = vcmask 138336  }
  0x91   :  { %83 = vst.msk [vmem:[#allocation0] sm:$0x1] %vm82_vm14, %v81_v39   ;;  %vm182_vm14 = vcmask 121936  }
  0x94   :  { %v93_v50 = vpop.permute.xlu1 %92  }
  0x95   :  { %v155_v51 = vpop.permute.xlu2 %154  }
  0x96   :  { %v87_v49 = vpop.permute.xlu0 %86  }
  0x97   :  { %89 = vst.msk [vmem:[#allocation0] sm:$0x1] %vm88_vm0, %v87_v49   ;;  %vm195_vm0 = vcmask 80936  }
  0x98   :  { %95 = vst.msk [vmem:[#allocation0] sm:$0x1] %vm94_vm1, %v93_v50   ;;  %vm201_vm1 = vcmask 56336  }
  0x99   :  { %101 = vst.msk [vmem:[#allocation0] sm:$0x1] %vm100_vm2, %v99_v42  }
  0x9c   :  { %v111_v53 = vpop.permute.xlu1 %110  }
  0x9d   :  { %v174_v54 = vpop.permute.xlu2 %173  }
  0x9e   :  { %v105_v52 = vpop.permute.xlu0 %104  }
  0x9f   :  { %107 = vst.msk [vmem:[#allocation0] sm:$0x1] %vm106_vm3, %v105_v52  }
  0xa0   :  { %113 = vst.msk [vmem:[#allocation0] sm:$0x1] %vm112_vm4, %v111_v53  }
  0xa1   :  { %119 = vst.msk [vmem:[#allocation0] sm:$0x1] %vm118_vm5, %v117_v45  }
  0xa4   :  { %v129_v56 = vpop.permute.xlu1 %128  }
  0xa5   :  { %v194_v57 = vpop.permute.xlu2 %193  }
  0xa6   :  { %v123_v55 = vpop.permute.xlu0 %122  }
  0xa7   :  { %125 = vst.msk [vmem:[#allocation0] sm:$0x1] %vm124_vm6, %v123_v55  }
  0xa8   :  { %131 = vst.msk [vmem:[#allocation0] sm:$0x1] %vm130_vm7, %v129_v56  }
  0xac   :  { %v148_v59 = vpop.permute.xlu1 %147  }
  0xad   :  { %151 = vst.msk [vmem:[#allocation0 + $0x8] sm:$0x1] %vm149_vm9, %v148_v59  }
  0xae   :  { %v142_v58 = vpop.permute.xlu0 %141  }
  0xaf   :  { %144 = vst.msk [vmem:[#allocation0] sm:$0x1] %vm143_vm8, %v142_v58  }
  0xb0   :  { %157 = vst.msk [vmem:[#allocation0] sm:$0x1] %vm156_vm10, %v155_v51  }
  0xb4   :  { %v168_v61 = vpop.permute.xlu1 %167  }
  0xb5   :  { %170 = vst.msk [vmem:[#allocation0] sm:$0x1] %vm169_vm12, %v168_v61  }
  0xb6   :  { %v161_v60 = vpop.permute.xlu0 %160  }
  0xb7   :  { %164 = vst.msk [vmem:[#allocation0 + $0x8] sm:$0x1] %vm162_vm11, %v161_v60  }
  0xb8   :  { %177 = vst.msk [vmem:[#allocation0 + $0x8] sm:$0x1] %vm175_vm13, %v174_v54  }
  0xbc   :  { %v187_v63 = vpop.permute.xlu1 %186  }
  0xbd   :  { %190 = vst.msk [vmem:[#allocation0 + $0x8] sm:$0x1] %vm188_vm15, %v187_v63  }
  0xbe   :  { %v181_v62 = vpop.permute.xlu0 %180  }
  0xbf   :  { %183 = vst.msk [vmem:[#allocation0] sm:$0x1] %vm182_vm14, %v181_v62  }
  0xc0   :  { %196 = vst.msk [vmem:[#allocation0] sm:$0x1] %vm195_vm0, %v194_v57  }
  0xc6   :  { %v200_v0 = vpop.permute.xlu0 %199  }
  0xc7   :  { %203 = vst.msk [vmem:[#allocation0 + $0x8] sm:$0x1] %vm201_vm1, %v200_v0   ;;  %v206_v1 = vld [vmem:[#allocation0] sm:$0x1] }
  0xc8   :  { %209 = vst [vmem:[%s427_s1] sm:$0x1] %v206_v1 }
  0xce   :  { %v211_v2 = vld [vmem:[#allocation0 + $0x8] sm:$0x1] }
  0xcf   :  { %248 = vst [vmem:[%s427_s1 + $0x1] sm:$0x1] %v211_v2 }

// kernel: net_forward.1
= control target key start
LH: loop header
LB: loop body
LE: loop exit
PB: predicated region body
PF: predicated region fallthrough
CT: control target
= control target key end

     0   :  { %s1335_s18 = smov 0   ;;  %s1742_s0 = inlined_call_operand.vmem [shape: f32[128,384], index: 0, kind: input, shape index: {}]   ;;  %s1743_s1 = inlined_call_operand.vmem [shape: bf16[384,160], index: 1, kind: input, shape index: {}]   ;;  %s1744_s2 = inlined_call_operand.vmem [shape: f32[1,160], index: 2, kind: input, shape index: {}]   ;;  %s1745_s3 = inlined_call_operand.vmem [shape: bf16[160,32], index: 3, kind: input, shape index: {}]   ;;  %s1746_s4 = inlined_call_operand.vmem [shape: f32[1,32], index: 4, kind: input, shape index: {}]   ;;  %s1747_s5 = inlined_call_operand.vmem [shape: f32[128,32], index: 5, kind: output, shape index: {}]  }
   0x1 LB: > { %s982_s19 = sadd.s32 4294967295, %s1303_s18   ;;  %p986_p0 = scmp.ge.s32.totalorder %s1303_s18, 1  ;;  %s1303_s18 = sphi %s1335_s18, %s15_s18  }
   0x2   : > { %p189_p1 = scmp.lt.s32.totalorder %s1303_s18, 3 }
   0x4   : > { %p190_p2 = pnand %p986_p0, %p189_p1 }
   0x5   : > { %s987_s17 = sshll.u32 (!%p190_p2), %s982_s19, 3 }
   0x6   : > { %193 = sbr.rel (%p190_p2) target bundleno = 442 (0x1ba), region = 40  ;;  %p219_p3 = scmp.lt.s32.totalorder (!%p190_p2), %s987_s17, 15 }
   0xb   : > { %v1049_v0 = vld [vmem:[%s1743_s1 + $0x70] sm:$0xf]  ;;  %v1244_v1 = vld [vmem:[%s1743_s1 + $0x74] sm:$0xf0]  ;;  %v1041_v9 = vld [vmem:[%s1743_s1 + $0x60] sm:$0xf] }
   0xc   : > { %v1113_v2 = vld [vmem:[%s1743_s1 + $0xf0] sm:$0xf]  ;;  %v1050_v3 = vor.u32 %v1244_v1, %v1049_v0  ;;  %v1260_v4 = vld [vmem:[%s1743_s1 + $0xf4] sm:$0xf0]  ;;  %v1242_v10 = vld [vmem:[%s1743_s1 + $0x64] sm:$0xf0] }
   0xd   : > { %v1177_v5 = vld [vmem:[%s1743_s1 + $0x170] sm:$0xf]  ;;  %v1276_v6 = vld [vmem:[%s1743_s1 + $0x174] sm:$0xf0]  ;;  %v1114_v7 = vor.u32 %v1260_v4, %v1113_v2  ;;  %v1105_v11 = vld [vmem:[%s1743_s1 + $0xe0] sm:$0xf]  ;;  %v1042_v12 = vor.u32 %v1242_v10, %v1041_v9 }
   0xe   : > { %v1178_v8 = vor.u32 %v1276_v6, %v1177_v5  ;;  %565 = vmatpush.bf16.msra.mxu0 %v1050_v3  ;;  %v1258_v13 = vld [vmem:[%s1743_s1 + $0xe4] sm:$0xf0]  ;;  %v1169_v14 = vld [vmem:[%s1743_s1 + $0x160] sm:$0xf]  ;;  %v1033_v18 = vld [vmem:[%s1743_s1 + $0x50] sm:$0xf] }
   0xf   : > { %v1274_v15 = vld [vmem:[%s1743_s1 + $0x164] sm:$0xf0]  ;;  %594 = vmatpush.bf16.msra.mxu1 %v1114_v7  ;;  %v1106_v16 = vor.u32 %v1258_v13, %v1105_v11  ;;  %v1240_v19 = vld [vmem:[%s1743_s1 + $0x54] sm:$0xf0]  ;;  %v1097_v20 = vld [vmem:[%s1743_s1 + $0xd0] sm:$0xf] }
  0x10   : > { %623 = vmatpush.bf16.msra.mxu2 %v1178_v8  ;;  %v1170_v17 = vor.u32 %v1274_v15, %v1169_v14  ;;  %v1256_v21 = vld [vmem:[%s1743_s1 + $0xd4] sm:$0xf0]  ;;  %v1161_v22 = vld [vmem:[%s1743_s1 + $0x150] sm:$0xf]  ;;  %v1034_v24 = vor.u32 %v1240_v19, %v1033_v18  ;;  %v1025_v27 = vld [vmem:[%s1743_s1 + $0x40] sm:$0xf] }
  0x11   : > { %v1272_v23 = vld [vmem:[%s1743_s1 + $0x154] sm:$0xf0]  ;;  %v1098_v25 = vor.u32 %v1256_v21, %v1097_v20  ;;  %v1238_v28 = vld [vmem:[%s1743_s1 + $0x44] sm:$0xf0]  ;;  %v1089_v29 = vld [vmem:[%s1743_s1 + $0xc0] sm:$0xf] }
  0x12   : > { %566 = vmatpush.bf16.msra.mxu0 %v1042_v12  ;;  %v1162_v26 = vor.u32 %v1272_v23, %v1161_v22  ;;  %v1254_v30 = vld [vmem:[%s1743_s1 + $0xc4] sm:$0xf0]  ;;  %v1153_v31 = vld [vmem:[%s1743_s1 + $0x140] sm:$0xf]  ;;  %v1026_v33 = vor.u32 %v1238_v28, %v1025_v27  ;;  %v1017_v36 = vld [vmem:[%s1743_s1 + $0x30] sm:$0xf] }
  0x13   : > { %595 = vmatpush.bf16.msra.mxu1 %v1106_v16  ;;  %v1270_v32 = vld [vmem:[%s1743_s1 + $0x144] sm:$0xf0]  ;;  %v1090_v34 = vor.u32 %v1254_v30, %v1089_v29  ;;  %v1236_v37 = vld [vmem:[%s1743_s1 + $0x34] sm:$0xf0]  ;;  %v1081_v38 = vld [vmem:[%s1743_s1 + $0xb0] sm:$0xf] }
  0x14   : > { %624 = vmatpush.bf16.msra.mxu2 %v1170_v17  ;;  %v1154_v35 = vor.u32 %v1270_v32, %v1153_v31  ;;  %v1252_v39 = vld [vmem:[%s1743_s1 + $0xb4] sm:$0xf0]  ;;  %v1145_v40 = vld [vmem:[%s1743_s1 + $0x130] sm:$0xf]  ;;  %v1018_v42 = vor.u32 %v1236_v37, %v1017_v36  ;;  %v1009_v43 = vld [vmem:[%s1743_s1 + $0x20] sm:$0xf] }
  0x15   : > { %v1268_v41 = vld [vmem:[%s1743_s1 + $0x134] sm:$0xf0]  ;;  %v1234_v44 = vld [vmem:[%s1743_s1 + $0x24] sm:$0xf0]  ;;  %v1082_v45 = vor.u32 %v1252_v39, %v1081_v38  ;;  %v1073_v47 = vld [vmem:[%s1743_s1 + $0xa0] sm:$0xf] }
  0x16   : > { %567 = vmatpush.bf16.msra.mxu0 %v1034_v24  ;;  %v1146_v46 = vor.u32 %v1268_v41, %v1145_v40  ;;  %v1250_v48 = vld [vmem:[%s1743_s1 + $0xa4] sm:$0xf0]  ;;  %v1137_v49 = vld [vmem:[%s1743_s1 + $0x120] sm:$0xf]  ;;  %v1001_v51 = vld [vmem:[%s1743_s1 + $0x10] sm:$0xf]  ;;  %v1010_v52 = vor.u32 %v1234_v44, %v1009_v43 }
  0x17   : > { %596 = vmatpush.bf16.msra.mxu1 %v1098_v25  ;;  %v1266_v50 = vld [vmem:[%s1743_s1 + $0x124] sm:$0xf0]  ;;  %v1232_v53 = vld [vmem:[%s1743_s1 + $0x14] sm:$0xf0]  ;;  %v1065_v54 = vld [vmem:[%s1743_s1 + $0x90] sm:$0xf]  ;;  %v1074_v55 = vor.u32 %v1250_v48, %v1073_v47 }
  0x18   : > { %625 = vmatpush.bf16.msra.mxu2 %v1162_v26  ;;  %s1749_s17 = smov (!%p219_p3, %s987_s17), 15  ;;  %v1138_v56 = vor.u32 %v1266_v50, %v1137_v49  ;;  %v1248_v57 = vld [vmem:[%s1743_s1 + $0x94] sm:$0xf0]  ;;  %v1243_v58 = vld [vmem:[%s1743_s1 + $0x74] sm:$0xf]  ;;  %v1002_v1 = vor.u32 %v1232_v53, %v1001_v51  ;;  %vm847_vm0 = vcmask 261120  }
  0x19   : > { %v1051_v59 = vld [vmem:[%s1743_s1 + $0x78] sm:$0xf0]  ;;  %v1129_v60 = vld [vmem:[%s1743_s1 + $0x110] sm:$0xf]  ;;  %v1264_v61 = vld [vmem:[%s1743_s1 + $0x114] sm:$0xf0]  ;;  %v1066_v6 = vor.u32 %v1248_v57, %v1065_v54 }
  0x1a   : > { %568 = vmatpush.bf16.msra.mxu0 %v1026_v33  ;;  %s1287_s14 = smul.u32 24, %s1749_s17  ;;  %v1054_v62 = vor.u32 %v1243_v58, %v1051_v59  ;;  %v1241_v63 = vld [vmem:[%s1743_s1 + $0x64] sm:$0xf]  ;;  %v1043_v0 = vld [vmem:[%s1743_s1 + $0x68] sm:$0xf0]  ;;  %v1130_v7 = vor.u32 %v1264_v61, %v1129_v60  ;;  %s990_s12 = sshll.u32 %s1749_s17, 3 }
  0x1b   : > { %597 = vmatpush.bf16.msra.mxu1 %v1090_v34  ;;  %v993_v2 = vld [vmem:[%s1743_s1] sm:$0xf]  ;;  %v1230_v3 = vld [vmem:[%s1743_s1 + $0x4] sm:$0xf0]  ;;  %v1046_v5 = vor.u32 %v1241_v63, %v1043_v0  ;;  %v1239_v9 = vld [vmem:[%s1743_s1 + $0x54] sm:$0xf]  ;;  %s1721_s15 = scalar_lea.vmem %s1747_s5, %s990_s12 }
  0x1c   : > { %626 = vmatpush.bf16.msra.mxu2 %v1154_v35  ;;  %v1057_v4 = vld [vmem:[%s1743_s1 + $0x80] sm:$0xf]  ;;  %652 = vmatpush.bf16.msra.mxu3 %v1054_v62  ;;  %v1246_v8 = vld [vmem:[%s1743_s1 + $0x84] sm:$0xf0]  ;;  %s1501_s6 = scalar_lea.vmem %s1742_s0, %s1287_s14  ;;  %v1035_v10 = vld [vmem:[%s1743_s1 + $0x58] sm:$0xf0]  ;;  %v994_v17 = vor.u32 %v1230_v3, %v993_v2 }
  0x1d   : > { %v1121_v11 = vld [vmem:[%s1743_s1 + $0x100] sm:$0xf]  ;;  %v1262_v12 = vld [vmem:[%s1743_s1 + $0x104] sm:$0xf0]  ;;  %v1259_v13 = vld [vmem:[%s1743_s1 + $0xf4] sm:$0xf]  ;;  %v1038_v21 = vor.u32 %v1239_v9, %v1035_v10  ;;  %v1058_v22 = vor.u32 %v1246_v8, %v1057_v4 }
  0x1e   : > { %569 = vmatpush.bf16.msra.mxu0 %v1018_v42  ;;  %v1115_v14 = vld [vmem:[%s1743_s1 + $0xf8] sm:$0xf0]  ;;  %v1275_v15 = vld [vmem:[%s1743_s1 + $0x174] sm:$0xf]  ;;  %v235_v18 = vld [vmem:[%s1501_s6] sm:$0xff]  ;;  %v1122_v23 = vor.u32 %v1262_v12, %v1121_v11 }
  0x1f   : > { %598 = vmatpush.bf16.msra.mxu1 %v1082_v45  ;;  %v1179_v16 = vld [vmem:[%s1743_s1 + $0x178] sm:$0xf0]  ;;  %v236_v20 = vld [vmem:[%s1501_s6 + $0x8] sm:$0xff]  ;;  %v239_v24 = vld [vmem:[%s1501_s6 + $0x20] sm:$0xff]  ;;  %v1118_v28 = vor.u32 %v1259_v13, %v1115_v14 }
  0x20   : > { %627 = vmatpush.bf16.msra.mxu2 %v1146_v46  ;;  %v238_v19 = vld [vmem:[%s1501_s6 + $0x18] sm:$0xff]  ;;  %653 = vmatpush.bf16.msra.mxu3 %v1046_v5  ;;  %v237_v25 = vld [vmem:[%s1501_s6 + $0x10] sm:$0xff]  ;;  %v240_v26 = vld [vmem:[%s1501_s6 + $0x28] sm:$0xff]  ;;  %v1182_v29 = vor.u32 %v1275_v15, %v1179_v16  ;;  %v1553_v36 = vpack.c.bf16 %v239_v24, %v236_v20 }
  0x21   : > { %v1257_v27 = vld [vmem:[%s1743_s1 + $0xe4] sm:$0xf]  ;;  %v1107_v30 = vld [vmem:[%s1743_s1 + $0xe8] sm:$0xf0]  ;;  %v1545_v33 = vpack.c.bf16 %v238_v19, %v235_v18  ;;  %v1555_v37 = vpack.c.bf16 %v240_v26, %v237_v25  ;;  %v1255_v41 = vld [vmem:[%s1743_s1 + $0xd4] sm:$0xf] }
  0x22   : > { %570 = vmatpush.bf16.msra.mxu0 %v1010_v52  ;;  %v1237_v31 = vld [vmem:[%s1743_s1 + $0x44] sm:$0xf]  ;;  %v1027_v32 = vld [vmem:[%s1743_s1 + $0x48] sm:$0xf0]  ;;  %v1110_v39 = vor.u32 %v1257_v27, %v1107_v30  ;;  %v1235_v42 = vld [vmem:[%s1743_s1 + $0x34] sm:$0xf] }
  0x23   : > { %599 = vmatpush.bf16.msra.mxu1 %v1074_v55  ;;  %v1273_v34 = vld [vmem:[%s1743_s1 + $0x164] sm:$0xf]  ;;  %v1171_v35 = vld [vmem:[%s1743_s1 + $0x168] sm:$0xf0]  ;;  %v1030_v38 = vor.u32 %v1237_v31, %v1027_v32  ;;  %v1019_v43 = vld [vmem:[%s1743_s1 + $0x38] sm:$0xf0] }
  0x24   : > { %628 = vmatpush.bf16.msra.mxu2 %v1138_v56  ;;  %654 = vmatpush.bf16.msra.mxu3 %v1038_v21  ;;  %v1174_v40 = vor.u32 %v1273_v34, %v1171_v35  ;;  %v1099_v44 = vld [vmem:[%s1743_s1 + $0xd8] sm:$0xf0]  ;;  %v1271_v45 = vld [vmem:[%s1743_s1 + $0x154] sm:$0xf]  ;;  %v1022_v47 = vor.u32 %v1235_v42, %v1019_v43  ;;  %v1253_v50 = vld [vmem:[%s1743_s1 + $0xc4] sm:$0xf] }
  0x25   : > { %v1163_v46 = vld [vmem:[%s1743_s1 + $0x158] sm:$0xf0]  ;;  %v1102_v48 = vor.u32 %v1255_v41, %v1099_v44  ;;  %v1233_v51 = vld [vmem:[%s1743_s1 + $0x24] sm:$0xf]  ;;  %v1011_v52 = vld [vmem:[%s1743_s1 + $0x28] sm:$0xf0] }
  0x26   : > { %571 = vmatpush.bf16.msra.mxu0 %v1002_v1  ;;  %v1166_v49 = vor.u32 %v1271_v45, %v1163_v46  ;;  %v1091_v53 = vld [vmem:[%s1743_s1 + $0xc8] sm:$0xf0]  ;;  %v1269_v54 = vld [vmem:[%s1743_s1 + $0x144] sm:$0xf]  ;;  %v1014_v56 = vor.u32 %v1233_v51, %v1011_v52  ;;  %v1251_v59 = vld [vmem:[%s1743_s1 + $0xb4] sm:$0xf] }
  0x27   : > { %600 = vmatpush.bf16.msra.mxu1 %v1066_v6  ;;  %v1155_v55 = vld [vmem:[%s1743_s1 + $0x148] sm:$0xf0]  ;;  %v1094_v57 = vor.u32 %v1253_v50, %v1091_v53  ;;  %v1231_v60 = vld [vmem:[%s1743_s1 + $0x14] sm:$0xf]  ;;  %v1003_v61 = vld [vmem:[%s1743_s1 + $0x18] sm:$0xf0] }
  0x28   : > { %629 = vmatpush.bf16.msra.mxu2 %v1130_v7  ;;  %655 = vmatpush.bf16.msra.mxu3 %v1030_v38  ;;  %v1158_v58 = vor.u32 %v1269_v54, %v1155_v55  ;;  %v1083_v62 = vld [vmem:[%s1743_s1 + $0xb8] sm:$0xf0]  ;;  %v1267_v63 = vld [vmem:[%s1743_s1 + $0x134] sm:$0xf]  ;;  %v244_v2 = vld [vmem:[%s1501_s6 + $0x48] sm:$0xff]  ;;  %v1006_v7 = vor.u32 %v1231_v60, %v1003_v61 }
  0x29   : > { %v1147_v0 = vld [vmem:[%s1743_s1 + $0x138] sm:$0xf0]  ;;  %v241_v1 = vld [vmem:[%s1501_s6 + $0x30] sm:$0xff]  ;;  %v243_v5 = vld [vmem:[%s1501_s6 + $0x40] sm:$0xff]  ;;  %v1086_v8 = vor.u32 %v1251_v59, %v1083_v62 }
  0x2a   : > { %572 = vmatpush.bf16.msra.mxu0 %v994_v17  ;;  %v242_v3 = vld [vmem:[%s1501_s6 + $0x38] sm:$0xff]  ;;  %v245_v4 = vld [vmem:[%s1501_s6 + $0x50] sm:$0xff]  ;;  %v1150_v9 = vor.u32 %v1267_v63, %v1147_v0  ;;  %v1249_v10 = vld [vmem:[%s1743_s1 + $0xa4] sm:$0xf]  ;;  %v262_v13 = vpack.c.bf16 %v244_v2, %v241_v1 }
  0x2b   : > { %601 = vmatpush.bf16.msra.mxu1 %v1058_v22  ;;  %v246_v6 = vld [vmem:[%s1501_s6 + $0x58] sm:$0xff]  ;;  %v1229_v11 = vld [vmem:[%s1743_s1 + $0x4] sm:$0xf]  ;;  %v995_v12 = vld [vmem:[%s1743_s1 + $0x8] sm:$0xf0]  ;;  %v263_v17 = vpack.c.bf16 %v245_v4, %v242_v3 }
  0x2c   : > { %630 = vmatpush.bf16.msra.mxu2 %v1122_v23  ;;  %656 = vmatpush.bf16.msra.mxu3 %v1022_v47  ;;  %v1075_v14 = vld [vmem:[%s1743_s1 + $0xa8] sm:$0xf0]  ;;  %v1265_v15 = vld [vmem:[%s1743_s1 + $0x124] sm:$0xf]  ;;  %v264_v18 = vpack.c.bf16 %v246_v6, %v243_v5  ;;  %v998_v19 = vor.u32 %v1229_v11, %v995_v12  ;;  %v1247_v22 = vld [vmem:[%s1743_s1 + $0x94] sm:$0xf] }
  0x2d   : > { %573 = vmatmul.bf16.vlgmr.msra.gmra.mxu0 %v1545_v33  ;;  %v1139_v16 = vld [vmem:[%s1743_s1 + $0x128] sm:$0xf0]  ;;  %v1078_v20 = vor.u32 %v1249_v10, %v1075_v14  ;;  %v1067_v23 = vld [vmem:[%s1743_s1 + $0x98] sm:$0xf0]  ;;  %v1263_v24 = vld [vmem:[%s1743_s1 + $0x114] sm:$0xf] }
  0x2e   : > { %681 = vmatpush.bf16.msrb.mxu0 %v1118_v28  ;;  %602 = vmatmul.bf16.vlgmr.msra.gmra.mxu1 %v1553_v36  ;;  %v1142_v21 = vor.u32 %v1265_v15, %v1139_v16  ;;  %v1131_v25 = vld [vmem:[%s1743_s1 + $0x118] sm:$0xf0]  ;;  %v1070_v26 = vor.u32 %v1247_v22, %v1067_v23  ;;  %v1245_v28 = vld [vmem:[%s1743_s1 + $0x84] sm:$0xf]  ;;  %v1123_v31 = vld [vmem:[%s1743_s1 + $0x108] sm:$0xf0] }
  0x2f   : > { %710 = vmatpush.bf16.msrb.mxu1 %v1182_v29  ;;  %631 = vmatmul.bf16.vlgmr.msra.gmra.mxu2 %v1555_v37  ;;  %v1134_v27 = vor.u32 %v1263_v24, %v1131_v25  ;;  %v1059_v29 = vld [vmem:[%s1743_s1 + $0x88] sm:$0xf0]  ;;  %v1261_v30 = vld [vmem:[%s1743_s1 + $0x104] sm:$0xf]  ;;  %v250_v38 = vld [vmem:[%s1501_s6 + $0x78] sm:$0xff] }
  0x30   : > { %657 = vmatpush.bf16.msra.mxu3 %v1014_v56  ;;  %v1062_v32 = vor.u32 %v1245_v28, %v1059_v29  ;;  %v1126_v34 = vor.u32 %v1261_v30, %v1123_v31  ;;  %v247_v35 = vld [vmem:[%s1501_s6 + $0x60] sm:$0xff]  ;;  %v249_v41 = vld [vmem:[%s1501_s6 + $0x70] sm:$0xff]  ;;  %v252_v42 = vld [vmem:[%s1501_s6 + $0x88] sm:$0xff] }
  0x31   : > { %v265_v43 = vpack.c.bf16 %v250_v38, %v247_v35  ;;  %v267_v44 = vpack.c.bf16 %v252_v42, %v249_v41  ;;  %v253_v45 = vld [vmem:[%s1501_s6 + $0x90] sm:$0xff]  ;;  %v256_v46 = vld [vmem:[%s1501_s6 + $0xa8] sm:$0xff]  ;;  %v254_v47 = vld [vmem:[%s1501_s6 + $0x98] sm:$0xff] }
  0x32   : > { %682 = vmatpush.bf16.msrb.mxu0 %v1110_v39  ;;  %v248_v39 = vld [vmem:[%s1501_s6 + $0x68] sm:$0xff]  ;;  %v258_v50 = vld [vmem:[%s1501_s6 + $0xb8] sm:$0xff]  ;;  %v268_v51 = vpack.c.bf16 %v256_v46, %v253_v45  ;;  %v1283_v55 = vld [vmem:[%s1745_s3 + $0x30] sm:$0xff] }
  0x33   : > { %711 = vmatpush.bf16.msrb.mxu1 %v1174_v40  ;;  %v251_v40 = vld [vmem:[%s1501_s6 + $0x80] sm:$0xff]  ;;  %v1284_v54 = vld [vmem:[%s1745_s3 + $0x38] sm:$0xff]  ;;  %v1282_v56 = vld [vmem:[%s1745_s3 + $0x28] sm:$0xff] }
  0x34   : > { %658 = vmatpush.bf16.msra.mxu3 %v1006_v7  ;;  %860 = vmatpush.bf16.msrb.mxu2 %v1284_v54  ;;  %v1277_v59 = vld [vmem:[%s1745_s3] sm:$0xff]  ;;  %v1286_v60 = vld [vmem:[%s1745_s3 + $0x48] sm:$0xff] }
  0x35   : > { %v319_v62 = vld [vmem:[%s1744_s2] sm:$0x3] }
  0x36   : > { %683 = vmatpush.bf16.msrb.mxu0 %v1102_v48  ;;  %v257_v48 = vld [vmem:[%s1501_s6 + $0xb0] sm:$0xff]  ;;  %v321_v0 = vperm.slane %v319_v62, 0  ;;  %v1285_v15 = vld [vmem:[%s1745_s3 + $0x40] sm:$0xff] }
  0x37   : > { %712 = vmatpush.bf16.msrb.mxu1 %v1166_v49  ;;  %v255_v49 = vld [vmem:[%s1501_s6 + $0xa0] sm:$0xff]  ;;  %v269_v52 = vpack.c.bf16 %v257_v48, %v254_v47 }
  0x38   : > { %659 = vmatpush.bf16.msra.mxu3 %v998_v19  ;;  %v270_v53 = vpack.c.bf16 %v258_v50, %v255_v49  ;;  %861 = vmatpush.bf16.msrb.mxu2 %v1283_v55 }
  0x3a   : > { %684 = vmatpush.bf16.msrb.mxu0 %v1094_v57  ;;  %v1279_v57 = vld [vmem:[%s1745_s3 + $0x10] sm:$0xff] }
  0x3b   : > { %713 = vmatpush.bf16.msrb.mxu1 %v1158_v58  ;;  %660 = vmatmul.bf16.vlgmr.msra.gmra.mxu3 %v1545_v33  ;;  %v266_v33 = vpack.c.bf16 %v251_v40, %v248_v39  ;;  %v1278_v58 = vld [vmem:[%s1745_s3 + $0x8] sm:$0xff] }
  0x3c   : > { %862 = vmatpush.bf16.msrb.mxu2 %v1282_v56  ;;  %895 = vmatpush.bf16.msrb.mxu3 %v1286_v60 }
  0x3d   : > { %578 = vmatmul.bf16.gmra.mxu0 %v262_v13 }
  0x3e   : > { %685 = vmatpush.bf16.msrb.mxu0 %v1086_v8  ;;  %607 = vmatmul.bf16.gmra.mxu1 %v263_v17 }
  0x3f   : > { %714 = vmatpush.bf16.msrb.mxu1 %v1150_v9  ;;  %636 = vmatmul.bf16.gmra.mxu2 %v264_v18 }
  0x40   : > { %896 = vmatpush.bf16.msrb.mxu3 %v1285_v15 }
  0x42   : > { %686 = vmatpush.bf16.msrb.mxu0 %v1078_v20 }
  0x43   : > { %715 = vmatpush.bf16.msrb.mxu1 %v1142_v21 }
  0x46   : > { %687 = vmatpush.bf16.msrb.mxu0 %v1070_v26 }
  0x47   : > { %716 = vmatpush.bf16.msrb.mxu1 %v1134_v27 }
  0x4a   : > { %688 = vmatpush.bf16.msrb.mxu0 %v1062_v32 }
  0x4b   : > { %717 = vmatpush.bf16.msrb.mxu1 %v1126_v34  ;;  %665 = vmatmul.bf16.gmra.mxu3 %v262_v13 }
  0x4d   : > { %583 = vmatmul.bf16.gmra.mxu0 %v265_v43 }
  0x4e   : > { %612 = vmatmul.bf16.gmra.mxu1 %v266_v33 }
  0x4f   : > { %641 = vmatmul.bf16.gmra.mxu2 %v267_v44 }
  0x5b   : > { %670 = vmatmul.bf16.gmra.mxu3 %v265_v43 }
  0x5d   : > { %588 = vmatmul.bf16.gmra.mxu0 %v268_v51 }
  0x5e   : > { %617 = vmatmul.bf16.gmra.mxu1 %v269_v52 }
  0x5f   : > { %646 = vmatmul.bf16.gmra.mxu2 %v270_v53 }
  0x6b   : > { %675 = vmatmul.bf16.gmra.mxu3 %v268_v51 }
  0x6d   : > { %689 = vmatmul.bf16.vlgmr.msrb.gmra.mxu0 %v1553_v36  ;;  %v1281_v36 = vld [vmem:[%s1745_s3 + $0x20] sm:$0xff] }
  0x6e   : > { %718 = vmatmul.bf16.vlgmr.msrb.gmra.mxu1 %v1555_v37  ;;  %863 = vmatpush.bf16.msrb.mxu2 %v1281_v36  ;;  %v1280_v37 = vld [vmem:[%s1745_s3 + $0x18] sm:$0xff]  ;;  %v322_v36 = vperm.slane %v319_v62, 1 }
  0x72   : > { %864 = vmatpush.bf16.msrb.mxu2 %v1280_v37 }
  0x76   : > { %865 = vmatpush.bf16.msrb.mxu2 %v1279_v57 }
  0x7a   : > { %866 = vmatpush.bf16.msrb.mxu2 %v1278_v58 }
  0x7d   : > { %694 = vmatmul.bf16.gmra.mxu0 %v263_v17 }
  0x7e   : > { %723 = vmatmul.bf16.gmra.mxu1 %v264_v18  ;;  %867 = vmatpush.bf16.msrb.mxu2 %v1277_v59 }
  0x8d   : > { %699 = vmatmul.bf16.gmra.mxu0 %v266_v33 }
  0x8e   : > { %728 = vmatmul.bf16.gmra.mxu1 %v267_v44 }
  0x9d   : > { %704 = vmatmul.bf16.gmra.mxu0 %v269_v52 }
  0x9e   : > { %733 = vmatmul.bf16.gmra.mxu1 %v270_v53 }
  0xaa   : > { %v574_v61 = vpop.f32.mrf.mxu0 }
  0xab   : > { %v603_v63 = vpop.f32.mrf.mxu1  ;;  %v575_v2 = vadd.f32 %v574_v61, %v321_v0 }
  0xad   : > { %v604_v6 = vadd.f32 %v603_v63, %v575_v2 }
  0xb2   : > { %v632_v1 = vpop.f32.mrf.mxu2  ;;  %v576_v3 = vpop.f32.mrf.mxu0 }
  0xb3   : > { %v605_v4 = vpop.f32.mrf.mxu1  ;;  %v577_v5 = vadd.f32 %v576_v3, %v321_v0  ;;  %v633_v7 = vadd.f32 %v632_v1, %v604_v6 }
  0xb5   : > { %v606_v8 = vadd.f32 %v605_v4, %v577_v5  ;;  %v739_v13 = vmax.f32 %v633_v7, 0.0 }
  0xba   : > { %v634_v9 = vpop.f32.mrf.mxu2  ;;  %v579_v11 = vpop.f32.mrf.mxu0 }
  0xbb   : > { %v635_v10 = vadd.f32 %v634_v9, %v606_v8  ;;  %v608_v12 = vpop.f32.mrf.mxu1  ;;  %v580_v18 = vadd.f32 %v579_v11, %v321_v0 }
  0xbd   : > { %v741_v14 = vmax.f32 %v635_v10, 0.0  ;;  %v609_v22 = vadd.f32 %v608_v12, %v580_v18 }
  0xbe   : > { %v661_v43 = vpop.f32.mrf.mxu3 }
  0xbf   : > { %v755_v16 = vpack.c.bf16 %v741_v14, %v739_v13  ;;  %v662_v61 = vadd.f32 %v661_v43, %v322_v36 }
  0xc1   : > { %868 = vmatmul.bf16.vlgmr.msrb.gmra.mxu2 %v755_v16 }
  0xc2   : > { %v637_v17 = vpop.f32.mrf.mxu2  ;;  %v581_v19 = vpop.f32.mrf.mxu0 }
  0xc3   : > { %v610_v20 = vpop.f32.mrf.mxu1  ;;  %v582_v21 = vadd.f32 %v581_v19, %v321_v0  ;;  %v638_v23 = vadd.f32 %v637_v17, %v609_v22 }
  0xc5   : > { %v611_v24 = vadd.f32 %v610_v20, %v582_v21  ;;  %v743_v29 = vmax.f32 %v638_v23, 0.0 }
  0xc6   : > { %v663_v53 = vpop.f32.mrf.mxu3 }
  0xc7   : > { %v664_v6 = vadd.f32 %v663_v53, %v322_v36 }
  0xca   : > { %v639_v25 = vpop.f32.mrf.mxu2  ;;  %v584_v27 = vpop.f32.mrf.mxu0 }
  0xcb   : > { %v640_v26 = vadd.f32 %v639_v25, %v611_v24  ;;  %v613_v28 = vpop.f32.mrf.mxu1  ;;  %v585_v34 = vadd.f32 %v584_v27, %v321_v0 }
  0xcd   : > { %v745_v30 = vmax.f32 %v640_v26, 0.0  ;;  %v614_v40 = vadd.f32 %v613_v28, %v585_v34 }
  0xce   : > { %v666_v3 = vpop.f32.mrf.mxu3 }
  0xcf   : > { %v757_v31 = vpack.c.bf16 %v745_v30, %v743_v29  ;;  %v667_v15 = vadd.f32 %v666_v3, %v322_v36 }
  0xd1   : > { %873 = vmatmul.bf16.gmra.mxu2 %v757_v31 }
  0xd2   : > { %v642_v32 = vpop.f32.mrf.mxu2  ;;  %v586_v35 = vpop.f32.mrf.mxu0 }
  0xd3   : > { %v615_v38 = vpop.f32.mrf.mxu1  ;;  %v587_v39 = vadd.f32 %v586_v35, %v321_v0  ;;  %v643_v41 = vadd.f32 %v642_v32, %v614_v40 }
  0xd5   : > { %v616_v42 = vadd.f32 %v615_v38, %v587_v39  ;;  %v747_v47 = vmax.f32 %v643_v41, 0.0 }
  0xd6   : > { %v668_v62 = vpop.f32.mrf.mxu3 }
  0xd7   : > { %v669_v19 = vadd.f32 %v668_v62, %v322_v36 }
  0xda   : > { %v644_v33 = vpop.f32.mrf.mxu2  ;;  %v589_v45 = vpop.f32.mrf.mxu0 }
  0xdb   : > { %v645_v44 = vadd.f32 %v644_v33, %v616_v42  ;;  %v618_v46 = vpop.f32.mrf.mxu1  ;;  %v590_v51 = vadd.f32 %v589_v45, %v321_v0 }
  0xdd   : > { %v749_v48 = vmax.f32 %v645_v44, 0.0  ;;  %v619_v56 = vadd.f32 %v618_v46, %v590_v51 }
  0xde   : > { %v671_v18 = vpop.f32.mrf.mxu3 }
  0xdf   : > { %v759_v49 = vpack.c.bf16 %v749_v48, %v747_v47  ;;  %v672_v30 = vadd.f32 %v671_v18, %v322_v36 }
  0xe1   : > { %878 = vmatmul.bf16.gmra.mxu2 %v759_v49 }
  0xe2   : > { %v647_v50 = vpop.f32.mrf.mxu2  ;;  %v591_v52 = vpop.f32.mrf.mxu0 }
  0xe3   : > { %v620_v54 = vpop.f32.mrf.mxu1  ;;  %v592_v55 = vadd.f32 %v591_v52, %v321_v0  ;;  %v648_v37 = vadd.f32 %v647_v50, %v619_v56 }
  0xe5   : > { %v621_v57 = vadd.f32 %v620_v54, %v592_v55  ;;  %v751_v1 = vmax.f32 %v648_v37, 0.0 }
  0xe6   : > { %v673_v28 = vpop.f32.mrf.mxu3 }
  0xe7   : > { %v674_v34 = vadd.f32 %v673_v28, %v322_v36 }
  0xea   : > { %v649_v58 = vpop.f32.mrf.mxu2  ;;  %v690_v60 = vpop.f32.mrf.mxu0 }
  0xeb   : > { %v650_v59 = vadd.f32 %v649_v58, %v621_v57  ;;  %v719_v63 = vpop.f32.mrf.mxu1  ;;  %v691_v5 = vadd.f32 %v690_v60, %v662_v61  ;;  %v1296_v60 = vld [vmem:[%s1746_s4] ss:$0 sm:$0xff] }
  0xed   : > { %v753_v2 = vmax.f32 %v650_v59, 0.0  ;;  %v720_v8 = vadd.f32 %v719_v63, %v691_v5 }
  0xee   : > { %v676_v41 = vpop.f32.mrf.mxu3 }
  0xef   : > { %v761_v4 = vpack.c.bf16 %v753_v2, %v751_v1  ;;  %v740_v11 = vmax.f32 %v720_v8, 0.0  ;;  %v677_v46 = vadd.f32 %v676_v41, %v322_v36 }
  0xf1   : > { %883 = vmatmul.bf16.gmra.mxu2 %v761_v4 }
  0xf2   : > { %v692_v7 = vpop.f32.mrf.mxu0 }
  0xf3   : > { %v693_v9 = vadd.f32 %v692_v7, %v664_v6  ;;  %v721_v0 = vpop.f32.mrf.mxu1 }
  0xf5   : > { %v722_v10 = vadd.f32 %v721_v0, %v693_v9 }
  0xf6   : > { %v678_v48 = vpop.f32.mrf.mxu3 }
  0xf7   : > { %v742_v12 = vmax.f32 %v722_v10, 0.0  ;;  %v679_v50 = vadd.f32 %v678_v48, %v322_v36 }
  0xf9   : > { %v756_v13 = vpack.c.bf16 %v742_v12, %v740_v11 }
  0xfa   : > { %v695_v14 = vpop.f32.mrf.mxu0 }
  0xfb   : > { %v724_v16 = vpop.f32.mrf.mxu1  ;;  %1223 = vmatmul.msk.bf16.vlgmr.msrb.gmra.mxu3 %vm847_vm0, %v756_v13  ;;  %v696_v17 = vadd.f32 %v695_v14, %v667_v15 }
  0xfd   : > { %v725_v21 = vadd.f32 %v724_v16, %v696_v17 }
  0xff   : > { %v744_v25 = vmax.f32 %v725_v21, 0.0 }
 0x102   : > { %v697_v20 = vpop.f32.mrf.mxu0 }
 0x103   : > { %v698_v22 = vadd.f32 %v697_v20, %v669_v19  ;;  %v726_v23 = vpop.f32.mrf.mxu1 }
 0x105   : > { %v727_v24 = vadd.f32 %v726_v23, %v698_v22 }
 0x107   : > { %v746_v26 = vmax.f32 %v727_v24, 0.0 }
 0x109   : > { %v758_v27 = vpack.c.bf16 %v746_v26, %v744_v25 }
 0x10a   : > { %v700_v29 = vpop.f32.mrf.mxu0 }
 0x10b   : > { %v729_v31 = vpop.f32.mrf.mxu1  ;;  %1224 = vmatmul.msk.bf16.gmra.mxu3 %vm847_vm0, %v758_v27  ;;  %v701_v32 = vadd.f32 %v700_v29, %v672_v30 }
 0x10d   : > { %v730_v38 = vadd.f32 %v729_v31, %v701_v32 }
 0x10f   : > { %v748_v43 = vmax.f32 %v730_v38, 0.0 }
 0x112   : > { %v702_v35 = vpop.f32.mrf.mxu0 }
 0x113   : > { %v703_v39 = vadd.f32 %v702_v35, %v674_v34  ;;  %v731_v40 = vpop.f32.mrf.mxu1 }
 0x115   : > { %v732_v42 = vadd.f32 %v731_v40, %v703_v39 }
 0x117   : > { %v750_v33 = vmax.f32 %v732_v42, 0.0 }
 0x119   : > { %v760_v44 = vpack.c.bf16 %v750_v33, %v748_v43 }
 0x11a   : > { %v705_v45 = vpop.f32.mrf.mxu0 }
 0x11b   : > { %v734_v47 = vpop.f32.mrf.mxu1  ;;  %1225 = vmatmul.msk.bf16.gmra.mxu3 %vm847_vm0, %v760_v44  ;;  %v706_v49 = vadd.f32 %v705_v45, %v677_v46 }
 0x11d   : > { %v735_v52 = vadd.f32 %v734_v47, %v706_v49 }
 0x11f   : > { %v752_v56 = vmax.f32 %v735_v52, 0.0 }
 0x122   : > { %v707_v51 = vpop.f32.mrf.mxu0 }
 0x123   : > { %v708_v53 = vadd.f32 %v707_v51, %v679_v50  ;;  %v736_v54 = vpop.f32.mrf.mxu1 }
 0x125   : > { %v737_v55 = vadd.f32 %v736_v54, %v708_v53 }
 0x127   : > { %v754_v37 = vmax.f32 %v737_v55, 0.0 }
 0x129   : > { %v762_v57 = vpack.c.bf16 %v754_v37, %v752_v56 }
 0x12b   : > { %1226 = vmatmul.msk.bf16.gmra.mxu3 %vm847_vm0, %v762_v57 }
 0x144   : > { %v869_v58 = vpop.f32.mrf.mxu2 }
 0x145   : > { %v870_v61 = vadd.f32 %v1296_v60, %v869_v58 }
 0x14c   : > { %v871_v59 = vpop.f32.mrf.mxu2 }
 0x14d   : > { %v872_v2 = vadd.f32 %v1296_v60, %v871_v59 }
 0x154   : > { %v874_v1 = vpop.f32.mrf.mxu2 }
 0x155   : > { %v875_v6 = vadd.f32 %v1296_v60, %v874_v1 }
 0x15c   : > { %v876_v5 = vpop.f32.mrf.mxu2 }
 0x15d   : > { %v877_v0 = vadd.f32 %v1296_v60, %v876_v5 }
 0x164   : > { %v879_v9 = vpop.f32.mrf.mxu2 }
 0x165   : > { %v880_v11 = vadd.f32 %v1296_v60, %v879_v9 }
 0x16c   : > { %v881_v12 = vpop.f32.mrf.mxu2 }
 0x16d   : > { %v882_v15 = vadd.f32 %v1296_v60, %v881_v12 }
 0x174   : > { %v884_v18 = vpop.f32.mrf.mxu2 }
 0x175   : > { %v885_v19 = vadd.f32 %v1296_v60, %v884_v18 }
 0x17c   : > { %v886_v22 = vpop.f32.mrf.mxu2 }
 0x17d   : > { %v887_v23 = vadd.f32 %v1296_v60, %v886_v22 }
 0x17e   : > { %v898_v36 = vpop.f32.mrf.mxu3 }
 0x17f   : > { %v899_v63 = vadd.f32 %v898_v36, %v870_v61 }
 0x181   : > { %918 = vst.msk [vmem:[%s1721_s15] sm:$0xff] %vm847_vm0, %v899_v63 }
 0x186   : > { %v900_v3 = vpop.f32.mrf.mxu3 }
 0x187   : > { %v901_v4 = vadd.f32 %v900_v3, %v872_v2 }
 0x189   : > { %919 = vst.msk [vmem:[%s1721_s15 + $0x8] sm:$0xff] %vm847_vm0, %v901_v4 }
 0x18e   : > { %v903_v7 = vpop.f32.mrf.mxu3 }
 0x18f   : > { %v904_v8 = vadd.f32 %v903_v7, %v875_v6 }
 0x191   : > { %920 = vst.msk [vmem:[%s1721_s15 + $0x10] sm:$0xff] %vm847_vm0, %v904_v8 }
 0x196   : > { %v905_v10 = vpop.f32.mrf.mxu3 }
 0x197   : > { %v906_v62 = vadd.f32 %v905_v10, %v877_v0 }
 0x199   : > { %921 = vst.msk [vmem:[%s1721_s15 + $0x18] sm:$0xff] %vm847_vm0, %v906_v62 }
 0x19e   : > { %v908_v13 = vpop.f32.mrf.mxu3 }
 0x19f   : > { %v909_v14 = vadd.f32 %v908_v13, %v880_v11 }
 0x1a1   : > { %922 = vst.msk [vmem:[%s1721_s15 + $0x20] sm:$0xff] %vm847_vm0, %v909_v14 }
 0x1a6   : > { %v910_v16 = vpop.f32.mrf.mxu3 }
 0x1a7   : > { %v911_v17 = vadd.f32 %v910_v16, %v882_v15 }
 0x1a9   : > { %923 = vst.msk [vmem:[%s1721_s15 + $0x28] sm:$0xff] %vm847_vm0, %v911_v17 }
 0x1ae   : > { %v913_v20 = vpop.f32.mrf.mxu3 }
 0x1af   : > { %v914_v21 = vadd.f32 %v913_v20, %v885_v19 }
 0x1b1   : > { %924 = vst.msk [vmem:[%s1721_s15 + $0x30] sm:$0xff] %vm847_vm0, %v914_v21 }
 0x1b6   : > { %v915_v24 = vpop.f32.mrf.mxu3 }
 0x1b7   : > { %v916_v25 = vadd.f32 %v915_v24, %v887_v23 }
 0x1b9   : > { %925 = vst.msk [vmem:[%s1721_s15 + $0x38] sm:$0xff] %vm847_vm0, %v916_v25 }
 0x1ba PF: > { %s15_s18 = sadd.s32 1, %s1303_s18  }
 0x1bb   : > { %p12_p4 = scmp.ge.s32.totalorder %s15_s18, 4  }
 0x1bd   :  { %14 = sbr.rel (!%p12_p4) target bundleno = 1 (0x1), region = 71 }

</bundles_post_ra>
